<compile_context>
chip_gen: v7x
topology: tpu7x:2x2x1
jax: 0.10.0
libtpu: 0.0.40
codegen_flags: <defaults>
</compile_context>

<pallas_src>
import functools

import jax
import jax.numpy as jnp
from jax.experimental import pallas as pl
from jax.experimental.pallas import tpu as pltpu


def _label_smoothing_ce_kernel(preds_ref, target_ref, out_ref,
                               smooth_acc, nll_acc, *,
                               epsilon, n_rows, tile_b, steps_per_split,
                               last_block, target_resident):
    # preds_ref: (TILE_B, C) VMEM (input dtype); target_ref: resident (B_pad,1)
    # or streamed (TILE_B,1) i32 VMEM; out_ref: (8,128) f32 VMEM partial block
    # per split; smooth_acc/nll_acc: (TILE_B,1) f32 VMEM accumulators.
    c = pl.program_id(0)          # split / core index  ("parallel")
    i = pl.program_id(1)          # batch-stream step    ("arbitrary")

    @pl.when(i == 0)
    def _init():
        smooth_acc[...] = jnp.zeros_like(smooth_acc)
        nll_acc[...] = jnp.zeros_like(nll_acc)

    n_cls = preds_ref.shape[-1]
    logical_block = c * steps_per_split + i

    # Row validity (partial tail tile / fully-masked overhang steps).
    row_ids = logical_block * tile_b + jax.lax.broadcasted_iota(
        jnp.int32, (tile_b, 1), 0)
    valid = row_ids < n_rows

    # Targets: slice the resident block, or take the streamed per-step block.
    if target_resident:
        blk = jnp.minimum(logical_block, last_block)
        t_start = blk * tile_b
        if tile_b % 8 == 0:
            t_start = pl.multiple_of(t_start, 8)
        tgt = target_ref[pl.ds(t_start, tile_b), :]          # (TILE_B, 1)
    else:
        tgt = target_ref[...]                                # (TILE_B, 1)

    # In-kernel upcast keeps HBM traffic at the input dtype width.
    preds = preds_ref[...].astype(jnp.float32)               # (TILE_B, C)

    # Fused log-softmax pieces; d is computed once and reused everywhere.
    m = jnp.max(preds, axis=-1, keepdims=True)                # (B,1)
    d = preds - m                                             # (B,C)
    lse = jnp.log(jnp.sum(jnp.exp(d), axis=-1, keepdims=True))  # (B,1)
    sum_d = jnp.sum(d, axis=-1, keepdims=True)                # (B,1)

    # Gather d[i, target[i]] via one-hot compare against a lane iota.
    col = jax.lax.broadcasted_iota(jnp.int32, d.shape, 1)     # (B,C)
    picked_d = jnp.sum(jnp.where(col == tgt, d, 0.0), axis=-1,
                       keepdims=True)                         # (B,1)

    # Per-row partials: -sum_c log_preds  and  -log_preds[i, target[i]].
    smooth_part = n_cls * lse - sum_d
    nll_part = lse - picked_d
    # Select (not multiply) so garbage/NaN in padded rows never propagates.
    smooth_acc[...] += jnp.where(valid, smooth_part, 0.0)
    nll_acc[...] += jnp.where(valid, nll_part, 0.0)

    @pl.when(i == pl.num_programs(1) - 1)
    def _finalize():
        nll_sum = jnp.sum(nll_acc[...])
        smooth_sum = jnp.sum(smooth_acc[...])
        partial = ((1.0 - epsilon) * nll_sum
                   + (epsilon / n_cls) * smooth_sum) / n_rows
        out_ref[...] = jnp.zeros(out_ref.shape, jnp.float32) + partial


def _round_up(x, m):
    return (x + m - 1) // m * m


def _choose_tile_b(b, c, itemsize,
                   target_input_bytes=4 * 1024 * 1024,
                   vmem_working_budget=40 * 1024 * 1024):
    # ~4 MiB of streamed input per tile (near HBM roofline, amortizes the
    # ~0.35 us per-step overhead), capped by the f32 working set so bf16
    # inputs don't silently triple VMEM pressure (important for v7x 64 MiB).
    rows = max(1, target_input_bytes // max(1, c * itemsize))
    per_row_working = c * (2 * itemsize + 3 * 4)   # 2x dbl-buffered in + 3 f32 temps
    rows = min(rows, max(1, vmem_working_budget // per_row_working))
    rows = max(16, (rows // 16) * 16)              # sublane-friendly for f32 & bf16
    return min(rows, _round_up(b, 16))


def label_smoothing_cross_entropy(preds, target, epsilon=0.1,
                                  tile_b=None, num_splits=2,
                                  target_resident=None):
    """preds: (B, C) float (f32/bf16); target: (B,) int. Returns scalar f32 loss.

    Matches LabelSmoothingCrossEntropy.forward with weight=None.
    """
    b, c = preds.shape
    if tile_b is None:
        tile_b = _choose_tile_b(b, c, preds.dtype.itemsize)

    n_blocks = pl.cdiv(b, tile_b)
    num_splits = max(1, min(int(num_splits), n_blocks))
    steps_per_split = pl.cdiv(n_blocks, num_splits)
    last_block = n_blocks - 1
    grid = (num_splits, steps_per_split)

    b_pad = n_blocks * tile_b
    target_i32 = target.astype(jnp.int32).reshape(b, 1)
    if target_resident is None:
        # (B_pad,1) i32 lane-pads to ~512 B/row in VMEM; stay resident only
        # while that footprint is small, otherwise stream per step.
        target_resident = b_pad * 512 <= 4 * 1024 * 1024

    def _blk(c_, i_):
        # Clamp overhang steps onto the last real block (no OOB DMA); their
        # rows are fully masked inside the kernel.
        return (jnp.minimum(c_ * steps_per_split + i_, last_block), 0)

    preds_spec = pl.BlockSpec((tile_b, c), _blk)
    if target_resident:
        target_arg = jnp.pad(target_i32, ((0, b_pad - b), (0, 0)))
        target_spec = pl.BlockSpec((b_pad, 1), lambda c_, i_: (0, 0))
    else:
        target_arg = target_i32
        target_spec = pl.BlockSpec((tile_b, 1), _blk)

    out = pl.pallas_call(
        functools.partial(
            _label_smoothing_ce_kernel,
            epsilon=float(epsilon), n_rows=b, tile_b=tile_b,
            steps_per_split=steps_per_split, last_block=last_block,
            target_resident=bool(target_resident)),
        out_shape=jax.ShapeDtypeStruct((num_splits * 8, 128), jnp.float32),
        grid=grid,
        in_specs=[preds_spec, target_spec],
        out_specs=pl.BlockSpec((8, 128), lambda c_, i_: (c_, 0)),
        scratch_shapes=[
            pltpu.VMEM((tile_b, 1), jnp.float32),   # smooth partials
            pltpu.VMEM((tile_b, 1), jnp.float32),   # nll partials
        ],
        compiler_params=pltpu.CompilerParams(
            dimension_semantics=("parallel", "arbitrary"),
            vmem_limit_bytes=48 * 1024 * 1024,      # > v5e 16 MiB default, < v7x 64 MiB
        ),
    )(preds, target_arg)

    # One (8,128) partial block per split; element [c*8, 0] holds the value.
    return jnp.sum(out[::8, 0])


def _reference(preds, target, epsilon=0.1):
    # Plain-JAX reference mirroring the PyTorch forward exactly.
    n = preds.shape[-1]
    log_preds = jax.nn.log_softmax(preds, axis=-1)
    loss = -jnp.mean(jnp.sum(log_preds, axis=-1))
    nll = -jnp.mean(jnp.take_along_axis(log_preds, target[:, None], axis=-1))
    return (1 - epsilon) * nll + epsilon * loss / n


if __name__ == "__main__":
    key = jax.random.PRNGKey(0)
    k1, k2, k3, k4, k5, k6 = jax.random.split(key, 6)

    # Case 1: f32 logits, B not a multiple of the tile, 2-way core split
    # (exercises multi-step pipeline + tail-row masking + per-split partials).
    b1, c1 = 10, 32
    preds1 = jax.random.normal(k1, (b1, c1), dtype=jnp.float32)
    tgt1 = jax.random.randint(k2, (b1,), 0, c1, dtype=jnp.int32)
    loss1 = jax.block_until_ready(
        label_smoothing_cross_entropy(preds1, tgt1, epsilon=0.1, tile_b=8))
    ref1 = _reference(preds1, tgt1, epsilon=0.1)
    assert jnp.allclose(loss1, ref1, atol=1e-5, rtol=1e-5), (loss1, ref1)

    # Case 2: bf16 logits, default tile size (in-kernel upcast path).
    b2, c2 = 16, 128
    preds2 = jax.random.normal(k3, (b2, c2), dtype=jnp.float32).astype(jnp.bfloat16)
    tgt2 = jax.random.randint(k4, (b2,), 0, c2, dtype=jnp.int32)
    loss2 = jax.block_until_ready(
        label_smoothing_cross_entropy(preds2, tgt2, epsilon=0.1))
    ref2 = _reference(preds2.astype(jnp.float32), tgt2, epsilon=0.1)
    assert jnp.allclose(loss2, ref2, atol=1e-4, rtol=1e-4), (loss2, ref2)

    # Case 3: uneven split -> clamped, fully-masked overhang grid step.
    b3, c3 = 24, 64
    preds3 = jax.random.normal(k5, (b3, c3), dtype=jnp.float32)
    tgt3 = jax.random.randint(k6, (b3,), 0, c3, dtype=jnp.int32)
    loss3 = jax.block_until_ready(
        label_smoothing_cross_entropy(preds3, tgt3, epsilon=0.1,
                                      tile_b=8, num_splits=2))
    ref3 = _reference(preds3, tgt3, epsilon=0.1)
    assert jnp.allclose(loss3, ref3, atol=1e-5, rtol=1e-5), (loss3, ref3)

    # Case 4: streamed (non-resident) target path.
    loss4 = jax.block_until_ready(
        label_smoothing_cross_entropy(preds1, tgt1, epsilon=0.1, tile_b=8,
                                      target_resident=False))
    assert jnp.allclose(loss4, ref1, atol=1e-5, rtol=1e-5), (loss4, ref1)

    print("KERNEL_OK")
</pallas_src>

<mosaic_0001>
module attributes {stable_mosaic.version = 11 : i64} {
  func.func @_label_smoothing_ce_kernel(%arg0: i32, %arg1: i32, %arg2: memref<8x32xf32, #tpu.memory_space<vmem>>, %arg3: memref<16x1xi32, #tpu.memory_space<vmem>>, %arg4: memref<8x128xf32, #tpu.memory_space<vmem>>, %arg5: memref<8x1xf32, #tpu.memory_space<vmem>>, %arg6: memref<8x1xf32, #tpu.memory_space<vmem>>) attributes {dimension_semantics = [#tpu.dimension_semantics<parallel>, #tpu.dimension_semantics<arbitrary>], iteration_bounds = array<i64: 2, 1>, scalar_prefetch = 0 : i64, scratch_operands = 2 : i64, tpu.core_type = #tpu.core_type<tc>, window_params = [{transform_indices = @transform_0, window_bounds = array<i64: 8, 32>}, {pipeline_mode = #tpu.pipeline_mode<synchronous>, transform_indices = @transform_1, window_bounds = array<i64: 16, 1>}, {transform_indices = @transform_2, window_bounds = array<i64: 8, 128>}]} {
    %c0_i32 = arith.constant 0 : i32
    %0 = arith.cmpi eq, %arg1, %c0_i32 : i32
    %1 = arith.extui %0 : i1 to i32
    %c0_i32_0 = arith.constant 0 : i32
    %2 = arith.cmpi ne, %1, %c0_i32_0 : i32
    scf.if %2 {
      %cst_22 = arith.constant 0.000000e+00 : f32
      %51 = vector.broadcast %cst_22 : f32 to vector<8x1xf32>
      %c0_23 = arith.constant 0 : index
      %c0_24 = arith.constant 0 : index
      %52 = vector.load %arg5[%c0_23, %c0_24] : memref<8x1xf32, #tpu.memory_space<vmem>>, vector<8x1xf32>
      tpu.vector_store %arg5[%c0_23, %c0_24], %51 {strides = array<i32>} : memref<8x1xf32, #tpu.memory_space<vmem>>, vector<8x1xf32>,
      %cst_25 = arith.constant 0.000000e+00 : f32
      %53 = vector.broadcast %cst_25 : f32 to vector<8x1xf32>
      %c0_26 = arith.constant 0 : index
      %c0_27 = arith.constant 0 : index
      %54 = vector.load %arg6[%c0_26, %c0_27] : memref<8x1xf32, #tpu.memory_space<vmem>>, vector<8x1xf32>
      tpu.vector_store %arg6[%c0_26, %c0_27], %53 {strides = array<i32>} : memref<8x1xf32, #tpu.memory_space<vmem>>, vector<8x1xf32>,
    } else {
    }
    %c1_i32 = arith.constant 1 : i32
    %3 = arith.muli %arg0, %c1_i32 : i32
    %4 = arith.addi %3, %arg1 : i32
    %c8_i32 = arith.constant 8 : i32
    %5 = arith.muli %4, %c8_i32 : i32
    %6 = tpu.iota {dimensions = array<i32: 0>} : vector<8x1xi32>
    %7 = vector.broadcast %5 : i32 to vector<8x1xi32>
    %8 = arith.addi %7, %6 : vector<8x1xi32>
    %c10_i32 = arith.constant 10 : i32
    %9 = vector.broadcast %c10_i32 : i32 to vector<8x1xi32>
    %10 = arith.cmpi slt, %8, %9 : vector<8x1xi32>
    %c1_i32_1 = arith.constant 1 : i32
    %11 = arith.minsi %4, %c1_i32_1 : i32
    %c8_i32_2 = arith.constant 8 : i32
    %12 = arith.muli %11, %c8_i32_2 : i32
    %13 = tpu.assume_multiple %12, 8 : i32
    %14 = arith.index_cast %13 : i32 to index
    %c0 = arith.constant 0 : index
    %15 = vector.load %arg3[%14, %c0] : memref<16x1xi32, #tpu.memory_space<vmem>>, vector<8x1xi32>
    %c0_3 = arith.constant 0 : index
    %c0_4 = arith.constant 0 : index
    %16 = vector.load %arg2[%c0_3, %c0_4] : memref<8x32xf32, #tpu.memory_space<vmem>>, vector<8x32xf32>
    %cst = arith.constant dense<0xFF800000> : vector<8xf32>
    %17 = vector.multi_reduction <maximumf>, %16, %cst [1] : vector<8x32xf32> to vector<8xf32>
    %18 = vector.shape_cast %17 : vector<8xf32> to vector<8x1xf32>
    %19 = vector.broadcast %18 : vector<8x1xf32> to vector<8x32xf32>
    %20 = arith.subf %16, %19 : vector<8x32xf32>
    %21 = math.exp %20 : vector<8x32xf32>
    %cst_5 = arith.constant dense<0.000000e+00> : vector<8xf32>
    %22 = vector.multi_reduction <add>, %21, %cst_5 [1] : vector<8x32xf32> to vector<8xf32>
    %23 = vector.shape_cast %22 : vector<8xf32> to vector<8x1xf32>
    %24 = math.log %23 : vector<8x1xf32>
    %cst_6 = arith.constant dense<0.000000e+00> : vector<8xf32>
    %25 = vector.multi_reduction <add>, %20, %cst_6 [1] : vector<8x32xf32> to vector<8xf32>
    %26 = vector.shape_cast %25 : vector<8xf32> to vector<8x1xf32>
    %27 = tpu.iota {dimensions = array<i32: 1>} : vector<8x32xi32>
    %28 = vector.broadcast %15 : vector<8x1xi32> to vector<8x32xi32>
    %29 = arith.cmpi eq, %27, %28 : vector<8x32xi32>
    %cst_7 = arith.constant 0.000000e+00 : f32
    %30 = vector.broadcast %cst_7 : f32 to vector<8x32xf32>
    %31 = arith.select %29, %20, %30 : vector<8x32xi1>, vector<8x32xf32>
    %cst_8 = arith.constant dense<0.000000e+00> : vector<8xf32>
    %32 = vector.multi_reduction <add>, %31, %cst_8 [1] : vector<8x32xf32> to vector<8xf32>
    %33 = vector.shape_cast %32 : vector<8xf32> to vector<8x1xf32>
    %cst_9 = arith.constant 3.200000e+01 : f32
    %34 = vector.broadcast %cst_9 : f32 to vector<8x1xf32>
    %35 = arith.mulf %34, %24 : vector<8x1xf32>
    %36 = arith.subf %35, %26 : vector<8x1xf32>
    %37 = arith.subf %24, %33 : vector<8x1xf32>
    %c0_10 = arith.constant 0 : index
    %c0_11 = arith.constant 0 : index
    %38 = vector.load %arg5[%c0_10, %c0_11] : memref<8x1xf32, #tpu.memory_space<vmem>>, vector<8x1xf32>
    %cst_12 = arith.constant 0.000000e+00 : f32
    %39 = vector.broadcast %cst_12 : f32 to vector<8x1xf32>
    %40 = arith.select %10, %36, %39 : vector<8x1xi1>, vector<8x1xf32>
    %41 = arith.addf %38, %40 : vector<8x1xf32>
    %c0_13 = arith.constant 0 : index
    %c0_14 = arith.constant 0 : index
    %42 = vector.load %arg5[%c0_13, %c0_14] : memref<8x1xf32, #tpu.memory_space<vmem>>, vector<8x1xf32>
    tpu.vector_store %arg5[%c0_13, %c0_14], %41 {strides = array<i32>} : memref<8x1xf32, #tpu.memory_space<vmem>>, vector<8x1xf32>,
    %c0_15 = arith.constant 0 : index
    %c0_16 = arith.constant 0 : index
    %43 = vector.load %arg6[%c0_15, %c0_16] : memref<8x1xf32, #tpu.memory_space<vmem>>, vector<8x1xf32>
    %cst_17 = arith.constant 0.000000e+00 : f32
    %44 = vector.broadcast %cst_17 : f32 to vector<8x1xf32>
    %45 = arith.select %10, %37, %44 : vector<8x1xi1>, vector<8x1xf32>
    %46 = arith.addf %43, %45 : vector<8x1xf32>
    %c0_18 = arith.constant 0 : index
    %c0_19 = arith.constant 0 : index
    %47 = vector.load %arg6[%c0_18, %c0_19] : memref<8x1xf32, #tpu.memory_space<vmem>>, vector<8x1xf32>
    tpu.vector_store %arg6[%c0_18, %c0_19], %46 {strides = array<i32>} : memref<8x1xf32, #tpu.memory_space<vmem>>, vector<8x1xf32>,
    %c0_i32_20 = arith.constant 0 : i32
    %48 = arith.cmpi eq, %arg1, %c0_i32_20 : i32
    %49 = arith.extui %48 : i1 to i32
    %c0_i32_21 = arith.constant 0 : i32
    %50 = arith.cmpi ne, %49, %c0_i32_21 : i32
    scf.if %50 {
      %c0_22 = arith.constant 0 : index
      %c0_23 = arith.constant 0 : index
      %51 = vector.load %arg6[%c0_22, %c0_23] : memref<8x1xf32, #tpu.memory_space<vmem>>, vector<8x1xf32>
      %52 = vector.shape_cast %51 : vector<8x1xf32> to vector<1x8x1xf32>
      %cst_24 = arith.constant dense<0.000000e+00> : vector<1xf32>
      %53 = vector.multi_reduction <add>, %52, %cst_24 [1, 2] : vector<1x8x1xf32> to vector<1xf32>
      %54 = vector.shape_cast %53 : vector<1xf32> to vector<1x1x1xf32>
      %55 = vector.extract %54[0, 0, 0] : f32 from vector<1x1x1xf32>
      %c0_25 = arith.constant 0 : index
      %c0_26 = arith.constant 0 : index
      %56 = vector.load %arg5[%c0_25, %c0_26] : memref<8x1xf32, #tpu.memory_space<vmem>>, vector<8x1xf32>
      %57 = vector.shape_cast %56 : vector<8x1xf32> to vector<1x8x1xf32>
      %cst_27 = arith.constant dense<0.000000e+00> : vector<1xf32>
      %58 = vector.multi_reduction <add>, %57, %cst_27 [1, 2] : vector<1x8x1xf32> to vector<1xf32>
      %59 = vector.shape_cast %58 : vector<1xf32> to vector<1x1x1xf32>
      %60 = vector.extract %59[0, 0, 0] : f32 from vector<1x1x1xf32>
      %cst_28 = arith.constant 0.899999976 : f32
      %61 = arith.mulf %cst_28, %55 : f32
      %cst_29 = arith.constant 3.125000e-03 : f32
      %62 = arith.mulf %cst_29, %60 : f32
      %63 = arith.addf %61, %62 : f32
      %cst_30 = arith.constant 1.000000e+01 : f32
      %64 = arith.divf %63, %cst_30 : f32
      %cst_31 = arith.constant 0.000000e+00 : f32
      %65 = vector.broadcast %cst_31 : f32 to vector<8x128xf32>
      %66 = vector.broadcast %64 : f32 to vector<8x128xf32>
      %67 = arith.addf %65, %66 : vector<8x128xf32>
      %c0_32 = arith.constant 0 : index
      %c0_33 = arith.constant 0 : index
      %68 = vector.load %arg4[%c0_32, %c0_33] : memref<8x128xf32, #tpu.memory_space<vmem>>, vector<8x128xf32>
      tpu.vector_store %arg4[%c0_32, %c0_33], %67 {strides = array<i32>} : memref<8x128xf32, #tpu.memory_space<vmem>>, vector<8x128xf32>,
    } else {
    }
    return
  }
  func.func @transform_0(%arg0: i32, %arg1: i32) -> (i32, i32) {
    %c1_i32 = arith.constant 1 : i32
    %0 = arith.muli %arg0, %c1_i32 : i32
    %1 = arith.addi %0, %arg1 : i32
    %c1_i32_0 = arith.constant 1 : i32
    %2 = arith.minsi %1, %c1_i32_0 : i32
    %c0_i32 = arith.constant 0 : i32
    %c0_i32_1 = arith.constant 0 : i32
    return %2, %c0_i32 : i32, i32
  }
  func.func @transform_1(%arg0: i32, %arg1: i32) -> (i32, i32) {
    %c0_i32 = arith.constant 0 : i32
    %c0_i32_0 = arith.constant 0 : i32
    %c0_i32_1 = arith.constant 0 : i32
    return %c0_i32, %c0_i32_0 : i32, i32
  }
  func.func @transform_2(%arg0: i32, %arg1: i32) -> (i32, i32) {
    %c0_i32 = arith.constant 0 : i32
    %c0_i32_0 = arith.constant 0 : i32
    return %arg0, %c0_i32 : i32, i32
  }
}

</mosaic_0001>

<bundles_post_ra>
// kernel: tpu_custom_call.1
= control target key start
LH: loop header
LB: loop body
LE: loop exit
PB: predicated region body
PF: predicated region fallthrough
CT: control target
= control target key end

     0   :  { %7 = vsyncpa [#allocation5], 0  ;;  %s652_s0 = inlined_call_operand.vmem [shape: f32[10,32], index: 0, kind: input, shape index: {}]   ;;  %s653_s1 = inlined_call_operand.vmem [shape: s32[16,1], index: 1, kind: input, shape index: {}]   ;;  %s654_s2 = inlined_call_operand.hbm [shape: f32[16,128], index: 2, kind: output, shape index: {}]  }
   0x1   :  { %9 = vsyncpa [#allocation5 + $0x1], 0  ;;  %s526_s9 = smov 0   ;;  %s528_s10 = smov 0  }
   0x2   :  { %s530_s11 = smov 0   ;;  %s532_s12 = smov 0  }
   0x3   :  { %s534_s13 = smov 0   ;;  %s536_s14 = smov 0  }
   0x4 LB: > { %s346_s15 = sadd.s32 4294967295, %s506_s14   ;;  %s347_s16 = sadd.s32 4294967294, %s506_s14   ;;  %s506_s14 = sphi %s536_s14, %s15_s14   ;;  %s502_s13 = sphi %s534_s13, %s661_s13   ;;  %s498_s12 = sphi %s532_s12, %s660_s12   ;;  %s494_s11 = sphi %s530_s11, %s659_s11   ;;  %s490_s10 = sphi %s528_s10, %s658_s10   ;;  %s486_s9 = sphi %s526_s9, %s657_s9  }
   0x5   : > { %s27_s17 = sadd.s32 1, %s502_s13  ;;  %s87_s18 = sadd.s32 1, %s494_s11 }
   0x6   : > { %p29_p0 = scmp.ge.s32.totalorder %s27_s17, 2  ;;  %p97_p1 = scmp.ne.s32.totalorder %s494_s11, %s490_s10 }
   0x7   : > { %p98_p2 = scmp.eq.s32.totalorder %s346_s15, 1  ;;  %p103_p3 = scmp.ne.s32.totalorder %s490_s10, %s486_s9 }
   0x8   : > { %s663_s17 = smov (%p29_p0, %s27_s17), 0  ;;  %p104_p5 = scmp.eq.s32.totalorder %s347_s16, 1 }
   0x9   : > { %p566_p4 = por %p98_p2, %p97_p1  ;;  %s84_s20 = ssub.s32 %s502_s13, %s663_s17 }
   0xa   : > { %p350_p6 = scmp.ge.s32.totalorder %s506_s14, 1  ;;  %p85_p7 = scmp.eq.s32.totalorder %s84_s20, 0 }
   0xb   : > { %p573_p8 = por %p104_p5, %p103_p3  ;;  %p138_p9 = scmp.lt.s32.totalorder %s506_s14, 3 }
   0xc   : > { %s579_s22 = scalar_select %p85_p7, %s494_s11, %s87_s18  }
   0xd   : > { %p139_p10 = pnand %p350_p6, %p138_p9 }
   0xe   : > { %p163_p11 = scmp.lt.s32.totalorder (!%p139_p10), %s498_s12, 1  ;;  %v508_v0 = vmov (!%p139_p10), 0   ;;  %vm192_vm0 = vcmask (!%p139_p10), 261120   ;;  %v181_v7 = vlaneseq (!%p139_p10)  ;;  %vm176_vm2 = vcmask (!%p139_p10), 7168   ;;  %s356_s5 = sshll.u32 (!%p139_p10), %s498_s12, 3 }
   0xf   : > { %142 = sbr.rel (%p139_p10) target bundleno = 586 (0x24a), region = 28  ;;  %423 = vset.pattern.permute.xlu0 (!%p139_p10), %v508_v0  ;;  %v509_v15 = vmov (!%p139_p10), 0.0   ;;  %v183_v18 = vstv (!%p139_p10), %s356_s5  ;;  %s159_s6 = sand.u32 (!%p139_p10), 1, %s490_s10  }
  0x10   : > { %v208_v8 = vand.u32 (!%p139_p10), 127, %v181_v7  ;;  %177 = vst.msk [vmem:[#allocation2] sm:$0xff] (!%p139_p10), %vm176_vm2, %v509_v15  ;;  %178 = vst.msk [vmem:[#allocation3] sm:$0xff] (!%p139_p10), %vm176_vm2, %v509_v15  ;;  %v182_v17 = vshrl.u32 (!%p139_p10), %v181_v7, 7  ;;  %s351_s7 = sshll.u32 (!%p139_p10), %s159_s6, 3  ;;  %s359_s20 = sshll.u32 (!%p139_p10), %s498_s12, 7 }
  0x11   : > { %s264_s30 = scalar_lea.sflag (!%p139_p10), [#allocation5], %s159_s6 }
  0x12   : > { %v184_v20 = vadd.s32 (!%p139_p10), %v183_v18, %v182_v17 }
  0x14   : > { %vm185_vm3 = vcmp.lt.s32.totalorder (!%p139_p10), %v184_v20, 10 }
  0x16   : > { %s164_s23 = scalar_select %p163_p11, %s498_s12, 1 }
  0x17   : > { %v225_v25 = vld [vmem:[#allocation3] sm:$0xff]  ;;  %v220_v27 = vld [vmem:[#allocation2] sm:$0xff]  ;;  %s510_s12 = smov [#allocation4]  }
  0x18   : > { %s166_s24 = scalar_select %p163_p11, %s164_s23, 1 }
  0x19   : > { %s357_s29 = sshll.u32 %s164_s23, 3 }
  0x1a   : > { %s355_s25 = sshll.u32 %s166_s24, 3  ;;  %s189_s4 = scalar_lea.vmem %s653_s1, %s357_s29 }
  0x1b   : > { %s168_s28 = scalar_lea.vmem %s652_s0, %s355_s25  ;;  %v190_v3 = vld [vmem:[%s189_s4] sm:$0xff]  ;;  %s161_s24 = scalar_lea.vmem [#allocation4], %s351_s7 }
  0x1c   : > { %v191_v1 = vld [vmem:[%s168_s28] sm:$0xff]  ;;  %s277_s25 = sshll.u32 %s161_s24, 4  ;;  %s605_s29 = scalar_lea.hbm %s654_s2, %s359_s20  ;;  %s607_s25 = int_to_ptr.vmem [resolvable:$true] %s277_s25 }
  0x1d   : > { %v193_v2 = vsel %vm192_vm0, %v191_v1, -inf  ;;  %s428_s3 = scalar_lea.vmem %s607_s25, 128  ;;  %s432_s4 = sshll.u32 %s510_s12, 4  ;;  %s433_s4 = int_to_ptr.vmem [resolvable:$false] %s432_s4 }
  0x1e   : > { %194 = vmax.xlane.f32.xlu0 %v193_v2  ;;  %p429_p12 = scmp.ne.s32.totalorder %s607_s25, %s428_s3  ;;  %s434_s5 = scalar_lea.vmem %s433_s4, 256 }
  0x1f   : > { %p435_p1 = scmp.lt.s32.totalorder %s607_s25, %s433_s4  ;;  %p436_p2 = scmp.lt.s32.totalorder %s434_s5, %s428_s3 }
  0x20   : > { %p430_p13 = pnand %p429_p12, %p566_p4 }
  0x21   : > { %p437_p3 = por %p436_p2, %p435_p1 }
  0x22   : > { %p431_p0 = pneg %p430_p13 }
  0x24   : > { %p438_p5 = pnand %p437_p3, %p431_p0 }
  0x34   : > { %210 = vperm.xlu0 %423, %v190_v3  }
  0xab   : > { %v195_v4 = vpop.xlane.xlu0 %194 }
  0xac   : > { %v196_v5 = vsub.f32 %v191_v1, %v195_v4 }
  0xae   : > { %v197_v6 = vmul.f32 1.442695, %v196_v5  ;;  %v204_v12 = vsel %vm192_vm0, %v196_v5, 0.0 }
  0xb0   : > { %424 = vpow2.f32 %v197_v6 }
  0xb3   : > { %v211_v10 = vpop.permute.xlu0 %210 }
  0xb4   : > { %vm212_vm1 = vcmp.eq.s32.totalorder %v208_v8, %v211_v10 }
  0xb5   : > { %v213_v13 = vsel %vm212_vm1, %v196_v5, 0.0 }
  0xb6   : > { %v214_v14 = vsel %vm192_vm0, %v213_v13, 0.0 }
  0xba   : > { %v425_v9 = vpop.eup %424 }
  0xbb   : > { %v199_v11 = vsel %vm192_vm0, %v425_v9, 0.0 }
  0xbc   : > { %200 = vadd.xlane.f32.xlu1 %v199_v11 }
  0xc0   : > { %205 = vadd.xlane.f32.xlu1 %v204_v12 }
  0xc4   : > { %215 = vadd.xlane.f32.xlu1 %v214_v14 }
 0x149   : > { %v201_v16 = vpop.xlane.xlu1 %200 }
 0x14a   : > { %426 = vlog2.f32 %v201_v16 }
 0x14d   : > { %v206_v19 = vpop.xlane.xlu1 %205 }
 0x151   : > { %v216_v23 = vpop.xlane.xlu1 %215 }
 0x154   : > { %v427_v21 = vpop.eup %426 }
 0x155   : > { %v203_v22 = vmul.f32 0.6931472, %v427_v21 }
 0x157   : > { %v217_v24 = vmul.f32 32.0, %v203_v22  ;;  %v219_v26 = vsub.f32 %v203_v22, %v216_v23 }
 0x159   : > { %v218_v28 = vsub.f32 %v217_v24, %v206_v19  ;;  %v226_v29 = vsel %vm185_vm3, %v219_v26, 0.0 }
 0x15a   : > { %v227_v30 = vadd.f32 %v226_v29, %v225_v25 }
 0x15b   : > { %v221_v31 = vsel %vm185_vm3, %v218_v28, 0.0 }
 0x15c   : > { %v222_v32 = vadd.f32 %v221_v31, %v220_v27  ;;  %228 = vst.msk [vmem:[#allocation3] sm:$0xff] %vm176_vm2, %v227_v30 }
 0x15e   : > { %224 = vst.msk [vmem:[#allocation2] sm:$0xff] %vm176_vm2, %v222_v32 }
 0x163   : > { %v232_v33 = vld [vmem:[#allocation3] sm:$0xff] }
 0x164   : > { %v233_v34 = vsel %vm176_vm2, %v232_v33, 0.0 }
 0x165   : > { %234 = vadd.xlane.f32.xlu1 %v233_v34  ;;  %v243_v35 = vld [vmem:[#allocation2] sm:$0xff] }
 0x166   : > { %v244_v36 = vsel %vm176_vm2, %v243_v35, 0.0 }
 0x169   : > { %245 = vadd.xlane.f32.xlu1 %v244_v36 }
 0x1f2   : > { %v235_v37 = vpop.xlane.xlu1 %234 }
 0x1f3   : > { %v236_v38 = vrot.slane %v235_v37, 4 }
 0x1f5   : > { %v237_v39 = vadd.f32 %v236_v38, %v235_v37 }
 0x1f6   : > { %v246_v40 = vpop.xlane.xlu1 %245 }
 0x1f7   : > { %v238_v41 = vrot.slane %v237_v39, 2  ;;  %v247_v42 = vrot.slane %v246_v40, 4 }
 0x1f9   : > { %v248_v43 = vadd.f32 %v247_v42, %v246_v40  ;;  %v239_v44 = vadd.f32 %v238_v41, %v237_v39 }
 0x1fb   : > { %v249_v45 = vrot.slane %v248_v43, 2  ;;  %v240_v46 = vrot.slane %v239_v44, 1 }
 0x1fd   : > { %v250_v47 = vadd.f32 %v249_v45, %v248_v43  ;;  %v241_v48 = vadd.f32 %v240_v46, %v239_v44 }
 0x1ff   : > { %362 = vpush %v241_v48  ;;  %v251_v49 = vrot.slane %v250_v47, 1 }
 0x201   : > { %v252_v50 = vadd.f32 %v251_v49, %v250_v47 }
 0x203   : > { %364 = vpush %v252_v50 }
 0x230   : > { %s363_s8 = spop %362 }
 0x231   : > { %s254_s15 = smul.f32 0.9, %s363_s8 }
 0x234   : > { %s365_s16 = spop %364 }
 0x235   : > { %s255_s18 = smul.f32 0.003125, %s365_s16 }
 0x237   : > { %s256_s23 = sadd.f32 %s255_s18, %s254_s15 }
 0x239   : > { %s259_s26 = smul.f32 0.1, %s256_s23 }
 0x23b   : > { %v260_v51 = vstv %s259_s26 }
 0x23c   : > { %262 = vst [vmem:[%s161_s24] sm:$0xff] %v260_v51 }
 0x23d   : > { %441 = shalt.err (!%p438_p5)
}
 0x23e   : > { %s442_s6 = scalar_lea.hbm %s605_s29, 128  ;;  %s446_s15 = scalar_lea.hbm %s654_s2, 256 }
 0x23f   : > { %p443_p6 = scmp.ne.s32.totalorder %s605_s29, %s442_s6  ;;  %p447_p10 = scmp.lt.u32.totalorder %s605_s29, %s654_s2 }
 0x240   : > { %p448_p11 = scmp.lt.u32.totalorder %s446_s15, %s442_s6  ;;  %p450_p13 = scmp.lt.u32.totalorder %s442_s6, %s605_s29 }
 0x241   : > { %p444_p7 = pnand %p443_p6, %p566_p4 }
 0x242   : > { %p449_p12 = por %p448_p11, %p447_p10 }
 0x243   : > { %p445_p9 = pneg %p444_p7 }
 0x244   : > { %p451_p0 = por %p450_p13, %p449_p12 }
 0x246   : > { %p452_p1 = pnand %p451_p0, %p445_p9 }
 0x248   : > { %455 = shalt.err (!%p452_p1)
}
 0x249   : > { %366 = dma.vmem_to_hbm [thread:$0]  (%p566_p4), %s607_s25, 128, %s605_s29, %s264_s30  }
 0x24a PF: > { %p372_p2 = scmp.ge.s32.totalorder %s506_s14, 2  ;;  %s289_s20 = sand.u32 1, %s486_s9  }
 0x24b   : > { %s290_s23 = scalar_lea.sflag [#allocation5], %s289_s20 }
 0x24c   : > { %p369_p3 = pnand %p372_p2, %p573_p8 }
 0x24e   : > { %481 = dma.done.wait (!%p369_p3), %s290_s23, 128  }
 0x24f   : > { %483 = vsyncadd (!%p369_p3), %s290_s23, 4294967168  ;;  %s15_s14 = sadd.s32 1, %s506_s14   ;;  %s657_s9 = smov %s490_s10 }
 0x250   : > { %p12_p5 = scmp.ge.s32.totalorder %s15_s14, 4   ;;  %s658_s10 = smov %s494_s11 }
 0x251   : > { %s659_s11 = smov %s579_s22  ;;  %s660_s12 = smov %s502_s13 }
 0x252   : > { %s661_s13 = smov %s663_s17  ;;  %14 = sbr.rel (!%p12_p5) target bundleno = 4 (0x4), region = 72 }
 0x259   :  { %295 = vsyncpa [#allocation5], 1 }
 0x25a   :  { %297 = vsyncpa [#allocation5 + $0x1], 1 }

</bundles_post_ra>
